<compile_context>
chip_gen: v6e
topology: v6e:2x2x1
jax: 0.10.0
libtpu: 0.0.40
codegen_flags: <defaults>
</compile_context>

<pallas_src>
import functools
import math

import jax
import jax.numpy as jnp
from jax.experimental import pallas as pl
from jax.experimental.pallas import tpu as pltpu


def _round_up(x: int, m: int) -> int:
    return -(-x // m) * m


def _ffn_kernel(x_ref, w1_ref, b1_ref, w2_ref, b2_ref, *rest, apply_dropout: bool):
    """One grid step: (row-tile i, d_ff-chunk k) of the fused FFN.

    x_ref  : (tm, dmp)     bf16   row tile of the input
    w1_ref : (dmp, tk_ff)  bf16   column chunk of W1
    b1_ref : (1, tk_ff)    f32    chunk of b1
    w2_ref : (tk_ff, dmp)  bf16   row chunk of W2
    b2_ref : (1, dmp)      f32    full b2
    [mask_ref : (tm, tk_ff) f32]  dropout keep/(1-p) mask chunk (train only)
    o_ref  : (tm, dmp)            output row tile (written on last k)
    acc_ref: (tm, dmp)     f32    VMEM accumulator (resident across k)
    """
    if apply_dropout:
        mask_ref, o_ref, acc_ref = rest
    else:
        mask_ref = None
        o_ref, acc_ref = rest

    k = pl.program_id(1)

    @pl.when(k == 0)
    def _():
        acc_ref[...] = jnp.zeros_like(acc_ref)

    # linear1 chunk + bias + relu (f32 accumulation on the MXU)
    h = jnp.dot(x_ref[...], w1_ref[...], preferred_element_type=jnp.float32)
    h = jnp.maximum(h + b1_ref[...], 0.0)

    if apply_dropout:
        h = h * mask_ref[...]          # mask already holds keep / (1 - p)

    # linear2 partial product, accumulated in f32
    acc_ref[...] += jnp.dot(h.astype(w2_ref.dtype), w2_ref[...],
                            preferred_element_type=jnp.float32)

    @pl.when(k == pl.num_programs(1) - 1)
    def _():
        o_ref[...] = (acc_ref[...] + b2_ref[...]).astype(o_ref.dtype)


def feed_forward_block(x, w1, b1, w2, b2, *,
                       dropout_rate: float = 0.0,
                       training: bool = False,
                       rng_key=None):
    """Pallas implementation of FeedForwardBlock.forward.

    x  : (..., d_model) float32
    w1 : (d_model, d_ff)    b1 : (d_ff,)     (weights stored as (in, out))
    w2 : (d_ff, d_model)    b2 : (d_model,)
    """
    orig_shape = x.shape
    orig_dtype = x.dtype
    d_model = orig_shape[-1]
    d_ff = w1.shape[1]
    M = math.prod(orig_shape[:-1])            # trace-time int, no device op
    x2 = x.reshape(M, d_model)

    compute_dtype = jnp.bfloat16

    # ---- tile sizes & padded dims -------------------------------------------
    dmp = _round_up(d_model, 128)             # lane-dense output last dim
    tk_ff = min(512, _round_up(d_ff, 128))    # d_ff reduction chunk
    dffp = _round_up(d_ff, tk_ff)
    tm = 256 if M >= 256 else _round_up(M, 8) # row tile (8-aligned, MXU-friendly)
    Mp = _round_up(M, tm)

    # ---- pad + cast operands (zero padding is exact for this computation) ----
    x_p = jnp.zeros((Mp, dmp), compute_dtype).at[:M, :d_model].set(
        x2.astype(compute_dtype))
    w1_p = jnp.zeros((dmp, dffp), compute_dtype).at[:d_model, :d_ff].set(
        w1.astype(compute_dtype))
    w2_p = jnp.zeros((dffp, dmp), compute_dtype).at[:d_ff, :d_model].set(
        w2.astype(compute_dtype))
    b1_p = jnp.zeros((1, dffp), jnp.float32).at[0, :d_ff].set(
        b1.astype(jnp.float32))
    b2_p = jnp.zeros((1, dmp), jnp.float32).at[0, :d_model].set(
        b2.astype(jnp.float32))

    apply_dropout = bool(training) and float(dropout_rate) > 0.0

    inputs = [x_p, w1_p, b1_p, w2_p, b2_p]
    in_specs = [
        pl.BlockSpec((tm, dmp),    lambda i, k: (i, 0)),   # x row tile
        pl.BlockSpec((dmp, tk_ff), lambda i, k: (0, k)),   # W1 column chunk
        pl.BlockSpec((1, tk_ff),   lambda i, k: (0, k)),   # b1 chunk
        pl.BlockSpec((tk_ff, dmp), lambda i, k: (k, 0)),   # W2 row chunk
        pl.BlockSpec((1, dmp),     lambda i, k: (0, 0)),   # b2 (grid-invariant)
    ]
    if apply_dropout:
        if rng_key is None:
            rng_key = jax.random.PRNGKey(0)
        keep = jax.random.bernoulli(rng_key, 1.0 - dropout_rate, (Mp, dffp))
        mask = keep.astype(jnp.float32) * (1.0 / (1.0 - dropout_rate))
        inputs.append(mask)
        in_specs.append(pl.BlockSpec((tm, tk_ff), lambda i, k: (i, k)))

    kernel = functools.partial(_ffn_kernel, apply_dropout=apply_dropout)

    out_p = pl.pallas_call(
        kernel,
        out_shape=jax.ShapeDtypeStruct((Mp, dmp), orig_dtype),
        grid_spec=pltpu.PrefetchScalarGridSpec(
            num_scalar_prefetch=0,
            grid=(Mp // tm, dffp // tk_ff),
            in_specs=in_specs,
            # Same output block across the reduction axis -> accumulator-resident.
            out_specs=pl.BlockSpec((tm, dmp), lambda i, k: (i, 0)),
            scratch_shapes=[pltpu.VMEM((tm, dmp), jnp.float32)],
        ),
        compiler_params=pltpu.CompilerParams(
            dimension_semantics=("parallel", "arbitrary"),
            vmem_limit_bytes=64 * 1024 * 1024,
        ),
    )(*inputs)

    return out_p[:M, :d_model].reshape(orig_shape)


def _init_linear_params(key, in_features, out_features):
    """Deterministic init matching nn.Linear's U(-1/sqrt(in), 1/sqrt(in))."""
    kw, kb = jax.random.split(key)
    bound = 1.0 / math.sqrt(in_features)
    # store weight as (in, out) so the kernel does x @ W directly
    w = jax.random.uniform(kw, (in_features, out_features),
                           minval=-bound, maxval=bound, dtype=jnp.float32)
    b = jax.random.uniform(kb, (out_features,),
                           minval=-bound, maxval=bound, dtype=jnp.float32)
    return w, b


if __name__ == "__main__":
    # Small shapes: (batch=2, seq=8, d_model=32), d_ff=64, dropout=0.1
    batch, seq, d_model, d_ff = 2, 8, 32, 64
    dropout_p = 0.1

    root = jax.random.PRNGKey(0)
    kx, k1, k2, kd = jax.random.split(root, 4)

    x = jax.random.normal(kx, (batch, seq, d_model), dtype=jnp.float32)
    w1, b1 = _init_linear_params(k1, d_model, d_ff)
    w2, b2 = _init_linear_params(k2, d_ff, d_model)

    # Eval-mode forward (dropout is the identity, as in PyTorch .eval()).
    out = feed_forward_block(x, w1, b1, w2, b2,
                             dropout_rate=dropout_p, training=False)
    out = jax.block_until_ready(out)

    # bf16-consistent pure-JAX reference for correctness.
    xb = x.reshape(-1, d_model).astype(jnp.bfloat16)
    w1b = w1.astype(jnp.bfloat16)
    w2b = w2.astype(jnp.bfloat16)
    h_ref = jnp.maximum(
        jnp.dot(xb, w1b, preferred_element_type=jnp.float32) + b1, 0.0)
    ref = (jnp.dot(h_ref.astype(jnp.bfloat16), w2b,
                   preferred_element_type=jnp.float32) + b2).reshape(x.shape)

    assert out.shape == x.shape
    assert jnp.allclose(out, ref, atol=2e-3, rtol=2e-3), "mismatch vs reference"

    # Also exercise the train-mode (stochastic dropout) path once.
    out_train = feed_forward_block(x, w1, b1, w2, b2,
                                   dropout_rate=dropout_p, training=True,
                                   rng_key=kd)
    out_train = jax.block_until_ready(out_train)
    assert out_train.shape == x.shape

    print("KERNEL_OK")
</pallas_src>

<mosaic_0001>
module attributes {stable_mosaic.version = 11 : i64} {
  func.func @_ffn_kernel(%arg0: i32, %arg1: i32, %arg2: memref<16x128xbf16, #tpu.memory_space<vmem>>, %arg3: memref<128x128xbf16, #tpu.memory_space<vmem>>, %arg4: memref<1x128xf32, #tpu.memory_space<vmem>>, %arg5: memref<128x128xbf16, #tpu.memory_space<vmem>>, %arg6: memref<1x128xf32, #tpu.memory_space<vmem>>, %arg7: memref<16x128xf32, #tpu.memory_space<vmem>>, %arg8: memref<16x128xf32, #tpu.memory_space<vmem>>) attributes {dimension_semantics = [#tpu.dimension_semantics<parallel>, #tpu.dimension_semantics<arbitrary>], iteration_bounds = array<i64: 1, 1>, scalar_prefetch = 0 : i64, scratch_operands = 1 : i64, tpu.core_type = #tpu.core_type<tc>, window_params = [{transform_indices = @transform_0, window_bounds = array<i64: 16, 128>}, {transform_indices = @transform_1, window_bounds = array<i64: 128, 128>}, {transform_indices = @transform_2, window_bounds = array<i64: 1, 128>}, {transform_indices = @transform_3, window_bounds = array<i64: 128, 128>}, {pipeline_mode = #tpu.pipeline_mode<synchronous>, transform_indices = @transform_4, window_bounds = array<i64: 1, 128>}, {transform_indices = @transform_5, window_bounds = array<i64: 16, 128>}]} {
    %c0_i32 = arith.constant 0 : i32
    %0 = arith.cmpi eq, %arg1, %c0_i32 : i32
    %1 = arith.extui %0 : i1 to i32
    %c0_i32_0 = arith.constant 0 : i32
    %2 = arith.cmpi ne, %1, %c0_i32_0 : i32
    scf.if %2 {
      %cst_16 = arith.constant 0.000000e+00 : f32
      %20 = vector.broadcast %cst_16 : f32 to vector<16x128xf32>
      %c0_17 = arith.constant 0 : index
      %c0_18 = arith.constant 0 : index
      %21 = vector.load %arg8[%c0_17, %c0_18] : memref<16x128xf32, #tpu.memory_space<vmem>>, vector<16x128xf32>
      tpu.vector_store %arg8[%c0_17, %c0_18], %20 {strides = array<i32>} : memref<16x128xf32, #tpu.memory_space<vmem>>, vector<16x128xf32>,
    } else {
    }
    %c0 = arith.constant 0 : index
    %c0_1 = arith.constant 0 : index
    %3 = vector.load %arg2[%c0, %c0_1] : memref<16x128xbf16, #tpu.memory_space<vmem>>, vector<16x128xbf16>
    %c0_2 = arith.constant 0 : index
    %c0_3 = arith.constant 0 : index
    %4 = vector.load %arg3[%c0_2, %c0_3] : memref<128x128xbf16, #tpu.memory_space<vmem>>, vector<128x128xbf16>
    %cst = arith.constant dense<0.000000e+00> : vector<16x128xf32>
    %5 = tpu.matmul %3, %4, %cst {dimension_numbers = #tpu.dot_dimension_numbers<[1], [0], [0], [1], [0, 0, 1, 1], [], []>} : vector<16x128xbf16>, vector<128x128xbf16>, vector<16x128xf32> -> vector<16x128xf32>
    %c0_4 = arith.constant 0 : index
    %c0_5 = arith.constant 0 : index
    %6 = vector.load %arg4[%c0_4, %c0_5] : memref<1x128xf32, #tpu.memory_space<vmem>>, vector<1x128xf32>
    %7 = vector.broadcast %6 : vector<1x128xf32> to vector<16x128xf32>
    %8 = arith.addf %5, %7 : vector<16x128xf32>
    %cst_6 = arith.constant 0.000000e+00 : f32
    %9 = vector.broadcast %cst_6 : f32 to vector<16x128xf32>
    %10 = arith.maximumf %8, %9 : vector<16x128xf32>
    %c0_7 = arith.constant 0 : index
    %c0_8 = arith.constant 0 : index
    %11 = vector.load %arg8[%c0_7, %c0_8] : memref<16x128xf32, #tpu.memory_space<vmem>>, vector<16x128xf32>
    %12 = arith.truncf %10 : vector<16x128xf32> to vector<16x128xbf16>
    %c0_9 = arith.constant 0 : index
    %c0_10 = arith.constant 0 : index
    %13 = vector.load %arg5[%c0_9, %c0_10] : memref<128x128xbf16, #tpu.memory_space<vmem>>, vector<128x128xbf16>
    %cst_11 = arith.constant dense<0.000000e+00> : vector<16x128xf32>
    %14 = tpu.matmul %12, %13, %cst_11 {dimension_numbers = #tpu.dot_dimension_numbers<[1], [0], [0], [1], [0, 0, 1, 1], [], []>} : vector<16x128xbf16>, vector<128x128xbf16>, vector<16x128xf32> -> vector<16x128xf32>
    %15 = arith.addf %11, %14 : vector<16x128xf32>
    %c0_12 = arith.constant 0 : index
    %c0_13 = arith.constant 0 : index
    %16 = vector.load %arg8[%c0_12, %c0_13] : memref<16x128xf32, #tpu.memory_space<vmem>>, vector<16x128xf32>
    tpu.vector_store %arg8[%c0_12, %c0_13], %15 {strides = array<i32>} : memref<16x128xf32, #tpu.memory_space<vmem>>, vector<16x128xf32>,
    %c0_i32_14 = arith.constant 0 : i32
    %17 = arith.cmpi eq, %arg1, %c0_i32_14 : i32
    %18 = arith.extui %17 : i1 to i32
    %c0_i32_15 = arith.constant 0 : i32
    %19 = arith.cmpi ne, %18, %c0_i32_15 : i32
    scf.if %19 {
      %c0_16 = arith.constant 0 : index
      %c0_17 = arith.constant 0 : index
      %20 = vector.load %arg8[%c0_16, %c0_17] : memref<16x128xf32, #tpu.memory_space<vmem>>, vector<16x128xf32>
      %c0_18 = arith.constant 0 : index
      %c0_19 = arith.constant 0 : index
      %21 = vector.load %arg6[%c0_18, %c0_19] : memref<1x128xf32, #tpu.memory_space<vmem>>, vector<1x128xf32>
      %22 = vector.broadcast %21 : vector<1x128xf32> to vector<16x128xf32>
      %23 = arith.addf %20, %22 : vector<16x128xf32>
      %c0_20 = arith.constant 0 : index
      %c0_21 = arith.constant 0 : index
      %24 = vector.load %arg7[%c0_20, %c0_21] : memref<16x128xf32, #tpu.memory_space<vmem>>, vector<16x128xf32>
      tpu.vector_store %arg7[%c0_20, %c0_21], %23 {strides = array<i32>} : memref<16x128xf32, #tpu.memory_space<vmem>>, vector<16x128xf32>,
    } else {
    }
    return
  }
  func.func @transform_0(%arg0: i32, %arg1: i32) -> (i32, i32) {
    %c0_i32 = arith.constant 0 : i32
    %c0_i32_0 = arith.constant 0 : i32
    return %arg0, %c0_i32 : i32, i32
  }
  func.func @transform_1(%arg0: i32, %arg1: i32) -> (i32, i32) {
    %c0_i32 = arith.constant 0 : i32
    %c0_i32_0 = arith.constant 0 : i32
    return %c0_i32, %arg1 : i32, i32
  }
  func.func @transform_2(%arg0: i32, %arg1: i32) -> (i32, i32) {
    %c0_i32 = arith.constant 0 : i32
    %c0_i32_0 = arith.constant 0 : i32
    return %c0_i32, %arg1 : i32, i32
  }
  func.func @transform_3(%arg0: i32, %arg1: i32) -> (i32, i32) {
    %c0_i32 = arith.constant 0 : i32
    %c0_i32_0 = arith.constant 0 : i32
    return %arg1, %c0_i32 : i32, i32
  }
  func.func @transform_4(%arg0: i32, %arg1: i32) -> (i32, i32) {
    %c0_i32 = arith.constant 0 : i32
    %c0_i32_0 = arith.constant 0 : i32
    %c0_i32_1 = arith.constant 0 : i32
    return %c0_i32, %c0_i32_0 : i32, i32
  }
  func.func @transform_5(%arg0: i32, %arg1: i32) -> (i32, i32) {
    %c0_i32 = arith.constant 0 : i32
    %c0_i32_0 = arith.constant 0 : i32
    return %arg0, %c0_i32 : i32, i32
  }
}

</mosaic_0001>

<bundles_post_ra>
// kernel: tpu_custom_call.1
= control target key start
LH: loop header
LB: loop body
LE: loop exit
PB: predicated region body
PF: predicated region fallthrough
CT: control target
= control target key end

     0   :  { %10 = vsyncpa [#allocation4], 0  ;;  %s585_s0 = inlined_call_operand.hbm [shape: bf16[16,128], index: 0, kind: input, shape index: {}]   ;;  %s586_s1 = inlined_call_operand.hbm [shape: bf16[128,128], index: 1, kind: input, shape index: {}]   ;;  %s587_s2 = inlined_call_operand.vmem [shape: f32[1,128], index: 2, kind: input, shape index: {}]   ;;  %s588_s3 = inlined_call_operand.hbm [shape: bf16[128,128], index: 3, kind: input, shape index: {}]   ;;  %s589_s4 = inlined_call_operand.vmem [shape: f32[1,128], index: 4, kind: input, shape index: {}]   ;;  %s590_s5 = inlined_call_operand.hbm [shape: f32[16,128], index: 5, kind: output, shape index: {}]  }
   0x1   :  { %11 = vsyncpa [#allocation7], 0 }
   0x2   :  { %12 = vsyncpa [#allocation5], 0  ;;  %s527_s18 = smov [#allocation6]   ;;  %s528_s20 = smov [#allocation3]  }
   0x3   :  { %s30_s19 = sshll.u32 %s527_s18, 4  ;;  %s18_s21 = sshll.u32 %s528_s20, 4  ;;  %s31_s19 = int_to_ptr.vmem [resolvable:$true] %s30_s19  ;;  %s19_s21 = int_to_ptr.vmem [resolvable:$true] %s18_s21 }
   0x4   :  { %s449_s22 = scalar_lea.vmem %s31_s19, 1024  ;;  %p454_p1 = scmp.lt.s32.totalorder %s31_s19, %s31_s19 }
   0x5   :  { %p450_p0 = scmp.ne.s32.totalorder %s31_s19, %s449_s22  ;;  %p455_p2 = scmp.lt.s32.totalorder %s449_s22, %s449_s22 }
   0x7   :  { %p456_p3 = por %p455_p2, %p454_p1 }
   0x9   :  { %p457_p4 = pnand %p456_p3, %p450_p0 }
   0xb   :  { %460 = shalt.err (!%p457_p4)
}
   0xc   :  { %s529_s23 = smov 64   ;;  %s530_s24 = smov 4  }
   0xd   :  { %36 = dma.hbm_to_vmem [thread:$0]  %s586_s1, 1024, %s31_s19, [#allocation7], %s529_s23, %s529_s23, %s530_s24  }
   0xe   :  { %s469_s27 = scalar_lea.vmem %s19_s21, 128  ;;  %p474_p6 = scmp.lt.s32.totalorder %s19_s21, %s19_s21 }
   0xf   :  { %p470_p5 = scmp.ne.s32.totalorder %s19_s21, %s469_s27  ;;  %p475_p7 = scmp.lt.s32.totalorder %s469_s27, %s469_s27 }
  0x11   :  { %p476_p8 = por %p475_p7, %p474_p6 }
  0x13   :  { %p477_p9 = pnand %p476_p8, %p470_p5 }
  0x15   :  { %480 = shalt.err (!%p477_p9)
}
  0x16   :  { %24 = dma.hbm_to_vmem [thread:$0]  %s585_s0, 128, %s19_s21, [#allocation4], %s529_s23, %s529_s23, %s530_s24  }
  0x17   :  { %s531_s30 = smov [#allocation8]  }
  0x18   :  { %s44_s6 = sshll.u32 %s531_s30, 4  ;;  %s45_s6 = int_to_ptr.vmem [resolvable:$true] %s44_s6 }
  0x19   :  { %s489_s7 = scalar_lea.vmem %s45_s6, 1024  ;;  %p494_p11 = scmp.lt.s32.totalorder %s45_s6, %s45_s6 }
  0x1a   :  { %p490_p10 = scmp.ne.s32.totalorder %s45_s6, %s489_s7  ;;  %p495_p12 = scmp.lt.s32.totalorder %s489_s7, %s489_s7 }
  0x1c   :  { %p496_p13 = por %p495_p12, %p494_p11 }
  0x1e   :  { %p497_p0 = pnand %p496_p13, %p490_p10 }
  0x20   :  { %500 = shalt.err (!%p497_p0)
}
  0x21   :  { %50 = dma.hbm_to_vmem [thread:$0]  %s588_s3, 1024, %s45_s6, [#allocation7], %s529_s23, %s529_s23, %s530_s24  }
  0x22   :  { %521 = dma.done.wait [#allocation4], 128  }
  0x23   :  { %522 = vsyncadd [#allocation4], 4294967168 }
  0x24   :  { %523 = dma.done.wait [#allocation7], 2048  }
  0x25   :  { %524 = vsyncadd [#allocation7], 4294965248  ;;  %v532_v0 = vmov 0.0   ;;  %vm533_vm0 = vmmov 0   ;;  %v424_v1 = vld [vmem:[#allocation6 + $0x38] sm:$0xff]   ;;  %v425_v2 = vld [vmem:[#allocation6 + $0x30] sm:$0xff]  }
  0x26   :  { %374 = vmatprep.subr.bf16.mxu0 %v532_v0  ;;  %390 = vmatprep.mubr.msk.bf16.mxu0 %vm533_vm0, %v532_v0  ;;  %v426_v3 = vld [vmem:[#allocation6 + $0x28] sm:$0xff]   ;;  %v433_v4 = vld [vmem:[#allocation8 + $0x38] sm:$0xff]   ;;  %v427_v5 = vld [vmem:[#allocation6 + $0x20] sm:$0xff]   ;;  %s534_s11 = smov [#allocation9]  }
  0x27   :  { %394 = vmatprep.subr.bf16.mxu1 %v532_v0  ;;  %410 = vmatprep.mubr.msk.bf16.mxu1 %vm533_vm0, %v532_v0  ;;  %v434_v6 = vld [vmem:[#allocation8 + $0x30] sm:$0xff]   ;;  %v428_v7 = vld [vmem:[#allocation6 + $0x18] sm:$0xff]   ;;  %v435_v8 = vld [vmem:[#allocation8 + $0x28] sm:$0xff]   ;;  %s324_s12 = sshll.u32 %s534_s11, 4  ;;  %s325_s12 = int_to_ptr.vmem [resolvable:$true] %s324_s12 }
  0x28   :  { %375 = vmatpush3.bf16.msra.mxu0 %v424_v1  ;;  %395 = vmatpush3.bf16.msra.mxu1 %v433_v4  ;;  %v429_v9 = vld [vmem:[#allocation6 + $0x10] sm:$0xff]   ;;  %v436_v10 = vld [vmem:[#allocation8 + $0x20] sm:$0xff]   ;;  %v430_v11 = vld [vmem:[#allocation6 + $0x8] sm:$0xff]   ;;  %p506_p2 = scmp.lt.s32.totalorder %s325_s12, %s325_s12 }
  0x29   :  { %376 = vmatprep.subr.bf16.mxu0 %v532_v0  ;;  %396 = vmatprep.subr.bf16.mxu1 %v532_v0  ;;  %v437_v12 = vld [vmem:[#allocation8 + $0x18] sm:$0xff]   ;;  %v431_v13 = vld [vmem:[#allocation6] sm:$0xff]   ;;  %v438_v15 = vld [vmem:[#allocation8 + $0x10] sm:$0xff]  }
  0x2a   :  { %v432_v14 = vld [vmem:[#allocation3] sm:$0xff]   ;;  %v439_v16 = vld [vmem:[#allocation8 + $0x8] sm:$0xff]   ;;  %v440_v17 = vld [vmem:[#allocation8] sm:$0xff]  }
  0x2b   :  { %v337_v18 = vld [vmem:[%s587_s2] ss:$0 sm:$0xff]  ;;  %s501_s2 = scalar_lea.vmem %s325_s12, 256 }
  0x2c   :  { %377 = vmatpush3.bf16.msra.mxu0 %v425_v2  ;;  %397 = vmatpush3.bf16.msra.mxu1 %v434_v6  ;;  %v355_v28 = vld [vmem:[%s589_s4] ss:$0 sm:$0xff]  ;;  %p502_p1 = scmp.ne.s32.totalorder %s325_s12, %s501_s2  ;;  %p507_p3 = scmp.lt.s32.totalorder %s501_s2, %s501_s2 }
  0x2d   :  { %378 = vmatprep.subr.bf16.mxu0 %v532_v0  ;;  %398 = vmatprep.subr.bf16.mxu1 %v532_v0 }
  0x2e   :  { %p508_p4 = por %p507_p3, %p506_p2 }
  0x30   :  { %379 = vmatpush3.bf16.msra.mxu0 %v426_v3  ;;  %399 = vmatpush3.bf16.msra.mxu1 %v435_v8  ;;  %p509_p5 = pnand %p508_p4, %p502_p1 }
  0x31   :  { %380 = vmatprep.subr.bf16.mxu0 %v532_v0  ;;  %400 = vmatprep.subr.bf16.mxu1 %v532_v0 }
  0x34   :  { %381 = vmatpush3.bf16.msra.mxu0 %v427_v5  ;;  %401 = vmatpush3.bf16.msra.mxu1 %v436_v10 }
  0x35   :  { %382 = vmatprep.subr.bf16.mxu0 %v532_v0  ;;  %402 = vmatprep.subr.bf16.mxu1 %v532_v0 }
  0x38   :  { %383 = vmatpush3.bf16.msra.mxu0 %v428_v7  ;;  %403 = vmatpush3.bf16.msra.mxu1 %v437_v12 }
  0x39   :  { %384 = vmatprep.subr.bf16.mxu0 %v532_v0  ;;  %404 = vmatprep.subr.bf16.mxu1 %v532_v0 }
  0x3c   :  { %385 = vmatpush3.bf16.msra.mxu0 %v429_v9  ;;  %405 = vmatpush3.bf16.msra.mxu1 %v438_v15 }
  0x3d   :  { %386 = vmatprep.subr.bf16.mxu0 %v532_v0  ;;  %406 = vmatprep.subr.bf16.mxu1 %v532_v0 }
  0x40   :  { %387 = vmatpush3.bf16.msra.mxu0 %v430_v11  ;;  %407 = vmatpush3.bf16.msra.mxu1 %v439_v16 }
  0x41   :  { %388 = vmatprep.subr.bf16.mxu0 %v532_v0  ;;  %408 = vmatprep.subr.bf16.mxu1 %v532_v0 }
  0x44   :  { %389 = vmatpush3.bf16.msra.mxu0 %v431_v13  ;;  %409 = vmatpush3.bf16.msra.mxu1 %v440_v17 }
  0x47   :  { %391 = vmatmul.mubr.bf16.vlgmr.msra.gmra.mxu0 %v432_v14 }
 0x107   :  { %v182_v19 = vpop.f32.mrf.mxu0 }
 0x108   :  { %v183_v21 = vadd.f32 %v337_v18, %v182_v19 }
 0x109   :  { %v392_v20 = vpop.f32.mrf.mxu0 }
 0x10a   :  { %v189_v25 = vmax.f32 %v183_v21, 0.0 }
 0x10b   :  { %v185_v22 = vpop.f32.mrf.mxu0 }
 0x10c   :  { %v186_v23 = vadd.f32 %v337_v18, %v185_v22 }
 0x10d   :  { %v393_v24 = vpop.f32.mrf.mxu0 }
 0x10e   :  { %v190_v26 = vmax.f32 %v186_v23, 0.0 }
 0x110   :  { %v193_v27 = vpack.c.bf16 %v190_v26, %v189_v25 }
 0x112   :  { %411 = vmatmul.mubr.bf16.vlgmr.msra.gmra.mxu1 %v193_v27 }
 0x1d2   :  { %v292_v29 = vpop.f32.mrf.mxu1 }
 0x1d3   :  { %v315_v30 = vadd.f32 %v355_v28, %v292_v29 }
 0x1d4   :  { %v412_v31 = vpop.f32.mrf.mxu1 }
 0x1d5   :  { %317 = vst [vmem:[#allocation9] sm:$0xff] %v315_v30 }
 0x1d6   :  { %v295_v32 = vpop.f32.mrf.mxu1 }
 0x1d7   :  { %v316_v33 = vadd.f32 %v355_v28, %v295_v32 }
 0x1d8   :  { %v413_v34 = vpop.f32.mrf.mxu1 }
 0x1d9   :  { %318 = vst [vmem:[#allocation9 + $0x8] sm:$0xff] %v316_v33 }
 0x1da   :  { %512 = shalt.err (!%p509_p5)
}
 0x1db   :  { %s535_s13 = smov 128   ;;  %s536_s4 = smov 8  }
 0x1dc   :  { %330 = dma.vmem_to_hbm [thread:$0]  %s325_s12, 256, %s590_s5, [#allocation5], %s535_s13, %s535_s13, %s536_s4  }
 0x1dd   :  { %525 = dma.done.wait [#allocation5], 256  }
 0x1de   :  { %526 = vsyncadd [#allocation5], 4294967040 }
 0x1df   :  { %334 = vsyncpa [#allocation4], 1 }
 0x1e0   :  { %335 = vsyncpa [#allocation7], 1 }
 0x1e1   :  { %336 = vsyncpa [#allocation5], 1 }

</bundles_post_ra>
